<compile_context>
chip_gen: v6e
topology: v6e:2x2x1
jax: 0.10.0
libtpu: 0.0.40
codegen_flags: <defaults>
</compile_context>

<pallas_src>
import functools

import jax
import jax.numpy as jnp
from jax import lax
from jax.experimental import pallas as pl
from jax.experimental.pallas import tpu as pltpu


def _round_up(x: int, m: int) -> int:
    return (x + m - 1) // m * m


# -----------------------------------------------------------------------------
# Fused whole-SAE kernel: one batch tile; all layers chained in-register.
# Refs: x, w_0..w_{L-1}, b_0..b_{L-1}, recon_out, z_out
# -----------------------------------------------------------------------------
def _sae_fused_kernel(*refs, n_layers: int, latent_after: int):
    x_ref = refs[0]
    w_refs = refs[1 : 1 + n_layers]
    b_refs = refs[1 + n_layers : 1 + 2 * n_layers]
    recon_ref = refs[1 + 2 * n_layers]
    z_ref = refs[2 + 2 * n_layers]

    h = x_ref[...].astype(jnp.float32)
    for idx in range(n_layers):
        # Linear (+ folded BN) on the MXU, f32 accumulation, then bias + ReLU.
        h = jnp.dot(h, w_refs[idx][...], preferred_element_type=jnp.float32)
        h = jnp.maximum(h + b_refs[idx][...], 0.0)
        if idx == latent_after - 1:
            z_ref[...] = h.astype(z_ref.dtype)       # latent written once
    recon_ref[...] = h.astype(recon_ref.dtype)


# -----------------------------------------------------------------------------
# FCLayer parameter folding (Linear + BatchNorm1d(eps=1e-3)) in f32.
# -----------------------------------------------------------------------------
def fold_fclayer(p, eps=1e-3):
    w = p["w"].astype(jnp.float32)              # (in_dim, out_dim)
    b = p["b"].astype(jnp.float32)              # (out_dim,)
    gamma = p["gamma"].astype(jnp.float32)
    beta = p["beta"].astype(jnp.float32)
    mean = p["running_mean"].astype(jnp.float32)
    var = p["running_var"].astype(jnp.float32)
    scale = gamma * lax.rsqrt(var + eps)
    w_f = w * scale[None, :]
    b_f = (b - mean) * scale + beta
    return w_f, b_f


def prepare_sae_params(enc_params, dec_params, eps=1e-3):
    """Fold BN into Linear and pad to lane multiples ONCE (outside hot path).

    Returns the layer list in application order:
      encoder layers in order, then decoder layers in reverse stack order.
    Padded K of layer i+1 equals padded N of layer i, so the lane-padded
    activation can be chained without any reshapes/slices between layers
    (zero-padded columns stay zero through ReLU and contribute nothing).
    """
    layer_params = list(enc_params) + list(reversed(dec_params))
    padded = []
    for p in layer_params:
        w, b = fold_fclayer(p, eps)
        K, N = w.shape
        Kp, Np = _round_up(K, 128), _round_up(N, 128)
        wp = jnp.pad(w, ((0, Kp - K), (0, Np - N)))
        bp = jnp.pad(b, (0, Np - N)).reshape(1, Np)
        padded.append((wp, bp))
    return padded


# -----------------------------------------------------------------------------
# SAE forward: (decode(encode(x)), encode(x)) in a single pallas_call.
# -----------------------------------------------------------------------------
def sae_forward_fused(x, padded_params, *, dim: int, latent_dim: int, n_enc: int):
    M, D = x.shape
    assert D == dim
    n_layers = len(padded_params)

    Dp = _round_up(D, 128)
    Zp = _round_up(latent_dim, 128)

    # Batch tile: exact 8-aligned extent for small/mid batches (no over-pad),
    # 256-row tiles for large batches (grid axis is "parallel" -> v7x 2 TCs).
    tm = _round_up(M, 8) if M <= 512 else 256
    Mp = _round_up(M, tm)

    xp = jnp.pad(x, ((0, Mp - M), (0, Dp - D)))

    ws = [w for (w, _) in padded_params]
    bs = [b for (_, b) in padded_params]

    in_specs = (
        [pl.BlockSpec((tm, Dp), lambda i: (i, 0))]                      # x: batch tiles
        + [pl.BlockSpec(w.shape, lambda i: (0, 0)) for w in ws]         # weights resident
        + [pl.BlockSpec(b.shape, lambda i: (0, 0)) for b in bs]         # biases resident
    )
    out_specs = [
        pl.BlockSpec((tm, Dp), lambda i: (i, 0)),                       # recon (lane-dense)
        pl.BlockSpec((tm, Zp), lambda i: (i, 0)),                       # latent (lane-dense)
    ]

    recon_p, z_p = pl.pallas_call(
        functools.partial(
            _sae_fused_kernel, n_layers=n_layers, latent_after=n_enc
        ),
        out_shape=(
            jax.ShapeDtypeStruct((Mp, Dp), x.dtype),
            jax.ShapeDtypeStruct((Mp, Zp), x.dtype),
        ),
        grid_spec=pltpu.PrefetchScalarGridSpec(
            num_scalar_prefetch=0,
            grid=(Mp // tm,),
            in_specs=in_specs,
            out_specs=out_specs,
        ),
        compiler_params=pltpu.CompilerParams(
            dimension_semantics=("parallel",),
        ),
    )(xp, *ws, *bs)

    return recon_p[:M, :D], z_p[:M, :latent_dim]


# -----------------------------------------------------------------------------
# Parameter construction + self-check
# -----------------------------------------------------------------------------
def init_fclayer(key, in_dim, out_dim):
    k1, k2, k3, k4, k5, k6 = jax.random.split(key, 6)
    w = jax.random.normal(k1, (in_dim, out_dim), jnp.float32) / jnp.sqrt(
        jnp.float32(in_dim)
    )
    b = 0.01 * jax.random.normal(k2, (out_dim,), jnp.float32)
    gamma = 1.0 + 0.1 * jax.random.normal(k3, (out_dim,), jnp.float32)
    beta = 0.1 * jax.random.normal(k4, (out_dim,), jnp.float32)
    running_mean = 0.1 * jax.random.normal(k5, (out_dim,), jnp.float32)
    running_var = jnp.abs(jax.random.normal(k6, (out_dim,), jnp.float32)) + 0.5
    return dict(
        w=w, b=b, gamma=gamma, beta=beta,
        running_mean=running_mean, running_var=running_var,
    )


if __name__ == "__main__":
    key = jax.random.PRNGKey(0)

    dim = 32
    stacks = [32, 16, 8]
    batch = 8

    key, kx = jax.random.split(key)
    x = jax.random.normal(kx, (batch, dim), jnp.float32)

    enc_params, dec_params = [], []
    prev = dim
    for s in stacks:
        key, ke, kd = jax.random.split(key, 3)
        enc_params.append(init_fclayer(ke, prev, s))   # encoder: prev -> s
        dec_params.append(init_fclayer(kd, s, prev))   # decoder: s -> prev
        prev = s

    # Fold BN + pad once (parameter-only work, outside the hot path).
    padded_params = prepare_sae_params(enc_params, dec_params)

    fwd = jax.jit(
        functools.partial(
            sae_forward_fused, dim=dim, latent_dim=stacks[-1], n_enc=len(stacks)
        )
    )
    recon, z = fwd(x, padded_params)
    jax.block_until_ready((recon, z))

    # Pure-JAX reference (eval-mode FCLayer = relu(x @ W' + b') with folded BN).
    def ref_layer(h, p):
        w, b = fold_fclayer(p)
        return jnp.maximum(h @ w + b, 0.0)

    h = x
    for p in enc_params:
        h = ref_layer(h, p)
    z_ref = h
    for p in reversed(dec_params):
        h = ref_layer(h, p)
    recon_ref = h

    assert recon.shape == (batch, dim) and z.shape == (batch, stacks[-1])
    assert jnp.allclose(z, z_ref, rtol=1e-4, atol=1e-4)
    assert jnp.allclose(recon, recon_ref, rtol=1e-4, atol=1e-4)

    print("KERNEL_OK")
</pallas_src>

<mosaic_0001>
module attributes {stable_mosaic.version = 11 : i64} {
  func.func @_sae_fused_kernel(%arg0: i32, %arg1: memref<8x128xf32, #tpu.memory_space<vmem>>, %arg2: memref<128x128xf32, #tpu.memory_space<vmem>>, %arg3: memref<128x128xf32, #tpu.memory_space<vmem>>, %arg4: memref<128x128xf32, #tpu.memory_space<vmem>>, %arg5: memref<128x128xf32, #tpu.memory_space<vmem>>, %arg6: memref<128x128xf32, #tpu.memory_space<vmem>>, %arg7: memref<128x128xf32, #tpu.memory_space<vmem>>, %arg8: memref<1x128xf32, #tpu.memory_space<vmem>>, %arg9: memref<1x128xf32, #tpu.memory_space<vmem>>, %arg10: memref<1x128xf32, #tpu.memory_space<vmem>>, %arg11: memref<1x128xf32, #tpu.memory_space<vmem>>, %arg12: memref<1x128xf32, #tpu.memory_space<vmem>>, %arg13: memref<1x128xf32, #tpu.memory_space<vmem>>, %arg14: memref<8x128xf32, #tpu.memory_space<vmem>>, %arg15: memref<8x128xf32, #tpu.memory_space<vmem>>) attributes {dimension_semantics = [#tpu.dimension_semantics<parallel>], iteration_bounds = array<i64: 1>, scalar_prefetch = 0 : i64, scratch_operands = 0 : i64, tpu.core_type = #tpu.core_type<tc>, window_params = [{transform_indices = @transform_0, window_bounds = array<i64: 8, 128>}, {pipeline_mode = #tpu.pipeline_mode<synchronous>, transform_indices = @transform_1, window_bounds = array<i64: 128, 128>}, {pipeline_mode = #tpu.pipeline_mode<synchronous>, transform_indices = @transform_2, window_bounds = array<i64: 128, 128>}, {pipeline_mode = #tpu.pipeline_mode<synchronous>, transform_indices = @transform_3, window_bounds = array<i64: 128, 128>}, {pipeline_mode = #tpu.pipeline_mode<synchronous>, transform_indices = @transform_4, window_bounds = array<i64: 128, 128>}, {pipeline_mode = #tpu.pipeline_mode<synchronous>, transform_indices = @transform_5, window_bounds = array<i64: 128, 128>}, {pipeline_mode = #tpu.pipeline_mode<synchronous>, transform_indices = @transform_6, window_bounds = array<i64: 128, 128>}, {pipeline_mode = #tpu.pipeline_mode<synchronous>, transform_indices = @transform_7, window_bounds = array<i64: 1, 128>}, {pipeline_mode = #tpu.pipeline_mode<synchronous>, transform_indices = @transform_8, window_bounds = array<i64: 1, 128>}, {pipeline_mode = #tpu.pipeline_mode<synchronous>, transform_indices = @transform_9, window_bounds = array<i64: 1, 128>}, {pipeline_mode = #tpu.pipeline_mode<synchronous>, transform_indices = @transform_10, window_bounds = array<i64: 1, 128>}, {pipeline_mode = #tpu.pipeline_mode<synchronous>, transform_indices = @transform_11, window_bounds = array<i64: 1, 128>}, {pipeline_mode = #tpu.pipeline_mode<synchronous>, transform_indices = @transform_12, window_bounds = array<i64: 1, 128>}, {transform_indices = @transform_13, window_bounds = array<i64: 8, 128>}, {transform_indices = @transform_14, window_bounds = array<i64: 8, 128>}]} {
    %c0 = arith.constant 0 : index
    %c0_0 = arith.constant 0 : index
    %0 = vector.load %arg1[%c0, %c0_0] : memref<8x128xf32, #tpu.memory_space<vmem>>, vector<8x128xf32>
    %c0_1 = arith.constant 0 : index
    %c0_2 = arith.constant 0 : index
    %1 = vector.load %arg2[%c0_1, %c0_2] : memref<128x128xf32, #tpu.memory_space<vmem>>, vector<128x128xf32>
    %cst = arith.constant dense<0.000000e+00> : vector<8x128xf32>
    %2 = tpu.matmul %0, %1, %cst {dimension_numbers = #tpu.dot_dimension_numbers<[1], [0], [0], [1], [0, 0, 1, 1], [], []>} : vector<8x128xf32>, vector<128x128xf32>, vector<8x128xf32> -> vector<8x128xf32>
    %c0_3 = arith.constant 0 : index
    %c0_4 = arith.constant 0 : index
    %3 = vector.load %arg8[%c0_3, %c0_4] : memref<1x128xf32, #tpu.memory_space<vmem>>, vector<1x128xf32>
    %4 = vector.broadcast %3 : vector<1x128xf32> to vector<8x128xf32>
    %5 = arith.addf %2, %4 : vector<8x128xf32>
    %cst_5 = arith.constant 0.000000e+00 : f32
    %6 = vector.broadcast %cst_5 : f32 to vector<8x128xf32>
    %7 = arith.maximumf %5, %6 : vector<8x128xf32>
    %c0_6 = arith.constant 0 : index
    %c0_7 = arith.constant 0 : index
    %8 = vector.load %arg3[%c0_6, %c0_7] : memref<128x128xf32, #tpu.memory_space<vmem>>, vector<128x128xf32>
    %cst_8 = arith.constant dense<0.000000e+00> : vector<8x128xf32>
    %9 = tpu.matmul %7, %8, %cst_8 {dimension_numbers = #tpu.dot_dimension_numbers<[1], [0], [0], [1], [0, 0, 1, 1], [], []>} : vector<8x128xf32>, vector<128x128xf32>, vector<8x128xf32> -> vector<8x128xf32>
    %c0_9 = arith.constant 0 : index
    %c0_10 = arith.constant 0 : index
    %10 = vector.load %arg9[%c0_9, %c0_10] : memref<1x128xf32, #tpu.memory_space<vmem>>, vector<1x128xf32>
    %11 = vector.broadcast %10 : vector<1x128xf32> to vector<8x128xf32>
    %12 = arith.addf %9, %11 : vector<8x128xf32>
    %cst_11 = arith.constant 0.000000e+00 : f32
    %13 = vector.broadcast %cst_11 : f32 to vector<8x128xf32>
    %14 = arith.maximumf %12, %13 : vector<8x128xf32>
    %c0_12 = arith.constant 0 : index
    %c0_13 = arith.constant 0 : index
    %15 = vector.load %arg4[%c0_12, %c0_13] : memref<128x128xf32, #tpu.memory_space<vmem>>, vector<128x128xf32>
    %cst_14 = arith.constant dense<0.000000e+00> : vector<8x128xf32>
    %16 = tpu.matmul %14, %15, %cst_14 {dimension_numbers = #tpu.dot_dimension_numbers<[1], [0], [0], [1], [0, 0, 1, 1], [], []>} : vector<8x128xf32>, vector<128x128xf32>, vector<8x128xf32> -> vector<8x128xf32>
    %c0_15 = arith.constant 0 : index
    %c0_16 = arith.constant 0 : index
    %17 = vector.load %arg10[%c0_15, %c0_16] : memref<1x128xf32, #tpu.memory_space<vmem>>, vector<1x128xf32>
    %18 = vector.broadcast %17 : vector<1x128xf32> to vector<8x128xf32>
    %19 = arith.addf %16, %18 : vector<8x128xf32>
    %cst_17 = arith.constant 0.000000e+00 : f32
    %20 = vector.broadcast %cst_17 : f32 to vector<8x128xf32>
    %21 = arith.maximumf %19, %20 : vector<8x128xf32>
    %c0_18 = arith.constant 0 : index
    %c0_19 = arith.constant 0 : index
    %22 = vector.load %arg15[%c0_18, %c0_19] : memref<8x128xf32, #tpu.memory_space<vmem>>, vector<8x128xf32>
    tpu.vector_store %arg15[%c0_18, %c0_19], %21 {strides = array<i32>} : memref<8x128xf32, #tpu.memory_space<vmem>>, vector<8x128xf32>,
    %c0_20 = arith.constant 0 : index
    %c0_21 = arith.constant 0 : index
    %23 = vector.load %arg5[%c0_20, %c0_21] : memref<128x128xf32, #tpu.memory_space<vmem>>, vector<128x128xf32>
    %cst_22 = arith.constant dense<0.000000e+00> : vector<8x128xf32>
    %24 = tpu.matmul %21, %23, %cst_22 {dimension_numbers = #tpu.dot_dimension_numbers<[1], [0], [0], [1], [0, 0, 1, 1], [], []>} : vector<8x128xf32>, vector<128x128xf32>, vector<8x128xf32> -> vector<8x128xf32>
    %c0_23 = arith.constant 0 : index
    %c0_24 = arith.constant 0 : index
    %25 = vector.load %arg11[%c0_23, %c0_24] : memref<1x128xf32, #tpu.memory_space<vmem>>, vector<1x128xf32>
    %26 = vector.broadcast %25 : vector<1x128xf32> to vector<8x128xf32>
    %27 = arith.addf %24, %26 : vector<8x128xf32>
    %cst_25 = arith.constant 0.000000e+00 : f32
    %28 = vector.broadcast %cst_25 : f32 to vector<8x128xf32>
    %29 = arith.maximumf %27, %28 : vector<8x128xf32>
    %c0_26 = arith.constant 0 : index
    %c0_27 = arith.constant 0 : index
    %30 = vector.load %arg6[%c0_26, %c0_27] : memref<128x128xf32, #tpu.memory_space<vmem>>, vector<128x128xf32>
    %cst_28 = arith.constant dense<0.000000e+00> : vector<8x128xf32>
    %31 = tpu.matmul %29, %30, %cst_28 {dimension_numbers = #tpu.dot_dimension_numbers<[1], [0], [0], [1], [0, 0, 1, 1], [], []>} : vector<8x128xf32>, vector<128x128xf32>, vector<8x128xf32> -> vector<8x128xf32>
    %c0_29 = arith.constant 0 : index
    %c0_30 = arith.constant 0 : index
    %32 = vector.load %arg12[%c0_29, %c0_30] : memref<1x128xf32, #tpu.memory_space<vmem>>, vector<1x128xf32>
    %33 = vector.broadcast %32 : vector<1x128xf32> to vector<8x128xf32>
    %34 = arith.addf %31, %33 : vector<8x128xf32>
    %cst_31 = arith.constant 0.000000e+00 : f32
    %35 = vector.broadcast %cst_31 : f32 to vector<8x128xf32>
    %36 = arith.maximumf %34, %35 : vector<8x128xf32>
    %c0_32 = arith.constant 0 : index
    %c0_33 = arith.constant 0 : index
    %37 = vector.load %arg7[%c0_32, %c0_33] : memref<128x128xf32, #tpu.memory_space<vmem>>, vector<128x128xf32>
    %cst_34 = arith.constant dense<0.000000e+00> : vector<8x128xf32>
    %38 = tpu.matmul %36, %37, %cst_34 {dimension_numbers = #tpu.dot_dimension_numbers<[1], [0], [0], [1], [0, 0, 1, 1], [], []>} : vector<8x128xf32>, vector<128x128xf32>, vector<8x128xf32> -> vector<8x128xf32>
    %c0_35 = arith.constant 0 : index
    %c0_36 = arith.constant 0 : index
    %39 = vector.load %arg13[%c0_35, %c0_36] : memref<1x128xf32, #tpu.memory_space<vmem>>, vector<1x128xf32>
    %40 = vector.broadcast %39 : vector<1x128xf32> to vector<8x128xf32>
    %41 = arith.addf %38, %40 : vector<8x128xf32>
    %cst_37 = arith.constant 0.000000e+00 : f32
    %42 = vector.broadcast %cst_37 : f32 to vector<8x128xf32>
    %43 = arith.maximumf %41, %42 : vector<8x128xf32>
    %c0_38 = arith.constant 0 : index
    %c0_39 = arith.constant 0 : index
    %44 = vector.load %arg14[%c0_38, %c0_39] : memref<8x128xf32, #tpu.memory_space<vmem>>, vector<8x128xf32>
    tpu.vector_store %arg14[%c0_38, %c0_39], %43 {strides = array<i32>} : memref<8x128xf32, #tpu.memory_space<vmem>>, vector<8x128xf32>,
    return
  }
  func.func @transform_0(%arg0: i32) -> (i32, i32) {
    %c0_i32 = arith.constant 0 : i32
    %c0_i32_0 = arith.constant 0 : i32
    return %arg0, %c0_i32 : i32, i32
  }
  func.func @transform_1(%arg0: i32) -> (i32, i32) {
    %c0_i32 = arith.constant 0 : i32
    %c0_i32_0 = arith.constant 0 : i32
    %c0_i32_1 = arith.constant 0 : i32
    return %c0_i32, %c0_i32_0 : i32, i32
  }
  func.func @transform_2(%arg0: i32) -> (i32, i32) {
    %c0_i32 = arith.constant 0 : i32
    %c0_i32_0 = arith.constant 0 : i32
    %c0_i32_1 = arith.constant 0 : i32
    return %c0_i32, %c0_i32_0 : i32, i32
  }
  func.func @transform_3(%arg0: i32) -> (i32, i32) {
    %c0_i32 = arith.constant 0 : i32
    %c0_i32_0 = arith.constant 0 : i32
    %c0_i32_1 = arith.constant 0 : i32
    return %c0_i32, %c0_i32_0 : i32, i32
  }
  func.func @transform_4(%arg0: i32) -> (i32, i32) {
    %c0_i32 = arith.constant 0 : i32
    %c0_i32_0 = arith.constant 0 : i32
    %c0_i32_1 = arith.constant 0 : i32
    return %c0_i32, %c0_i32_0 : i32, i32
  }
  func.func @transform_5(%arg0: i32) -> (i32, i32) {
    %c0_i32 = arith.constant 0 : i32
    %c0_i32_0 = arith.constant 0 : i32
    %c0_i32_1 = arith.constant 0 : i32
    return %c0_i32, %c0_i32_0 : i32, i32
  }
  func.func @transform_6(%arg0: i32) -> (i32, i32) {
    %c0_i32 = arith.constant 0 : i32
    %c0_i32_0 = arith.constant 0 : i32
    %c0_i32_1 = arith.constant 0 : i32
    return %c0_i32, %c0_i32_0 : i32, i32
  }
  func.func @transform_7(%arg0: i32) -> (i32, i32) {
    %c0_i32 = arith.constant 0 : i32
    %c0_i32_0 = arith.constant 0 : i32
    %c0_i32_1 = arith.constant 0 : i32
    return %c0_i32, %c0_i32_0 : i32, i32
  }
  func.func @transform_8(%arg0: i32) -> (i32, i32) {
    %c0_i32 = arith.constant 0 : i32
    %c0_i32_0 = arith.constant 0 : i32
    %c0_i32_1 = arith.constant 0 : i32
    return %c0_i32, %c0_i32_0 : i32, i32
  }
  func.func @transform_9(%arg0: i32) -> (i32, i32) {
    %c0_i32 = arith.constant 0 : i32
    %c0_i32_0 = arith.constant 0 : i32
    %c0_i32_1 = arith.constant 0 : i32
    return %c0_i32, %c0_i32_0 : i32, i32
  }
  func.func @transform_10(%arg0: i32) -> (i32, i32) {
    %c0_i32 = arith.constant 0 : i32
    %c0_i32_0 = arith.constant 0 : i32
    %c0_i32_1 = arith.constant 0 : i32
    return %c0_i32, %c0_i32_0 : i32, i32
  }
  func.func @transform_11(%arg0: i32) -> (i32, i32) {
    %c0_i32 = arith.constant 0 : i32
    %c0_i32_0 = arith.constant 0 : i32
    %c0_i32_1 = arith.constant 0 : i32
    return %c0_i32, %c0_i32_0 : i32, i32
  }
  func.func @transform_12(%arg0: i32) -> (i32, i32) {
    %c0_i32 = arith.constant 0 : i32
    %c0_i32_0 = arith.constant 0 : i32
    %c0_i32_1 = arith.constant 0 : i32
    return %c0_i32, %c0_i32_0 : i32, i32
  }
  func.func @transform_13(%arg0: i32) -> (i32, i32) {
    %c0_i32 = arith.constant 0 : i32
    %c0_i32_0 = arith.constant 0 : i32
    return %arg0, %c0_i32 : i32, i32
  }
  func.func @transform_14(%arg0: i32) -> (i32, i32) {
    %c0_i32 = arith.constant 0 : i32
    %c0_i32_0 = arith.constant 0 : i32
    return %arg0, %c0_i32 : i32, i32
  }
}

</mosaic_0001>

<bundles_post_ra>
// kernel: sae_forward_fused.1
= control target key start
LH: loop header
LB: loop body
LE: loop exit
PB: predicated region body
PF: predicated region fallthrough
CT: control target
= control target key end

     0   :  { %20 = vsyncpa [#allocation3], 0  ;;  %s1489_s0 = inlined_call_operand.vmem [shape: f32[8,128], index: 0, kind: input, shape index: {}]   ;;  %s1490_s1 = inlined_call_operand.hbm [shape: f32[128,128], index: 1, kind: input, shape index: {}]   ;;  %s1491_s2 = inlined_call_operand.hbm [shape: f32[128,128], index: 2, kind: input, shape index: {}]   ;;  %s1492_s3 = inlined_call_operand.hbm [shape: f32[128,128], index: 3, kind: input, shape index: {}]   ;;  %s1493_s4 = inlined_call_operand.hbm [shape: f32[128,128], index: 4, kind: input, shape index: {}]   ;;  %s1494_s5 = inlined_call_operand.hbm [shape: f32[128,128], index: 5, kind: input, shape index: {}]   ;;  %s1495_s6 = inlined_call_operand.hbm [shape: f32[128,128], index: 6, kind: input, shape index: {}]   ;;  %s1496_s7 = inlined_call_operand.vmem [shape: f32[1,128], index: 7, kind: input, shape index: {}]   ;;  %s1497_s8 = inlined_call_operand.vmem [shape: f32[1,128], index: 8, kind: input, shape index: {}]   ;;  %s1498_s9 = inlined_call_operand.vmem [shape: f32[1,128], index: 9, kind: input, shape index: {}]   ;;  %s1499_s10 = inlined_call_operand.vmem [shape: f32[1,128], index: 10, kind: input, shape index: {}]   ;;  %s1500_s11 = inlined_call_operand.vmem [shape: f32[1,128], index: 11, kind: input, shape index: {}]   ;;  %s1501_s12 = inlined_call_operand.vmem [shape: f32[1,128], index: 12, kind: input, shape index: {}]   ;;  %s1502_s13 = inlined_call_operand.hbm [shape: f32[8,128], index: 13, kind: output, shape index: {0}]   ;;  %s1503_s14 = inlined_call_operand.hbm [shape: f32[8,128], index: 14, kind: output, shape index: {1}]  }
   0x1   :  { %21 = vsyncpa [#allocation6], 0 }
   0x2   :  { %22 = vsyncpa [#allocation9], 0 }
   0x3   :  { %23 = vsyncpa [#allocation12], 0 }
   0x4   :  { %24 = vsyncpa [#allocation4], 0 }
   0x5   :  { %25 = vsyncpa [#allocation15], 0  ;;  %s1231_s29 = smov [#allocation5]   ;;  %s1232_s15 = smov [#allocation8]  }
   0x6   :  { %s45_s30 = sshll.u32 %s1231_s29, 4  ;;  %s69_s16 = sshll.u32 %s1232_s15, 4  ;;  %s46_s30 = int_to_ptr.vmem [resolvable:$true] %s45_s30  ;;  %s70_s16 = int_to_ptr.vmem [resolvable:$true] %s69_s16 }
   0x7   :  { %s1067_s17 = scalar_lea.vmem %s46_s30, 2048  ;;  %p1072_p1 = scmp.lt.s32.totalorder %s46_s30, %s46_s30 }
   0x8   :  { %p1068_p0 = scmp.ne.s32.totalorder %s46_s30, %s1067_s17  ;;  %p1073_p2 = scmp.lt.s32.totalorder %s1067_s17, %s1067_s17 }
   0xa   :  { %p1074_p3 = por %p1073_p2, %p1072_p1 }
   0xc   :  { %p1075_p4 = pnand %p1074_p3, %p1068_p0 }
   0xe   :  { %1078 = shalt.err (!%p1075_p4)
}
   0xf   :  { %s1233_s18 = smov 128   ;;  %s1234_s19 = smov 8  }
  0x10   :  { %51 = dma.hbm_to_vmem [thread:$0]  %s1491_s2, 2048, %s46_s30, [#allocation6], %s1233_s18, %s1233_s18, %s1234_s19  }
  0x11   :  { %s1087_s22 = scalar_lea.vmem %s70_s16, 2048  ;;  %p1092_p6 = scmp.lt.s32.totalorder %s70_s16, %s70_s16 }
  0x12   :  { %p1088_p5 = scmp.ne.s32.totalorder %s70_s16, %s1087_s22  ;;  %p1093_p7 = scmp.lt.s32.totalorder %s1087_s22, %s1087_s22 }
  0x14   :  { %p1094_p8 = por %p1093_p7, %p1092_p6 }
  0x16   :  { %p1095_p9 = pnand %p1094_p8, %p1088_p5 }
  0x18   :  { %1098 = shalt.err (!%p1095_p9)
}
  0x19   :  { %75 = dma.hbm_to_vmem [thread:$0]  %s1493_s4, 2048, %s70_s16, [#allocation9], %s1233_s18, %s1233_s18, %s1234_s19  }
  0x1a   :  { %s1235_s25 = smov [#allocation2]   ;;  %s1236_s27 = smov [#allocation7]  }
  0x1b   :  { %s33_s26 = sshll.u32 %s1235_s25, 4  ;;  %s57_s28 = sshll.u32 %s1236_s27, 4  ;;  %s34_s26 = int_to_ptr.vmem [resolvable:$true] %s33_s26  ;;  %s58_s28 = int_to_ptr.vmem [resolvable:$true] %s57_s28 }
  0x1c   :  { %s1107_s2 = scalar_lea.vmem %s34_s26, 2048  ;;  %p1112_p11 = scmp.lt.s32.totalorder %s34_s26, %s34_s26 }
  0x1d   :  { %p1108_p10 = scmp.ne.s32.totalorder %s34_s26, %s1107_s2  ;;  %p1113_p12 = scmp.lt.s32.totalorder %s1107_s2, %s1107_s2 }
  0x1f   :  { %p1114_p13 = por %p1113_p12, %p1112_p11 }
  0x21   :  { %p1115_p0 = pnand %p1114_p13, %p1108_p10 }
  0x23   :  { %1118 = shalt.err (!%p1115_p0)
}
  0x24   :  { %39 = dma.hbm_to_vmem [thread:$0]  %s1490_s1, 2048, %s34_s26, [#allocation3], %s1233_s18, %s1233_s18, %s1234_s19  }
  0x25   :  { %s1127_s4 = scalar_lea.vmem %s58_s28, 2048  ;;  %p1132_p2 = scmp.lt.s32.totalorder %s58_s28, %s58_s28 }
  0x26   :  { %p1128_p1 = scmp.ne.s32.totalorder %s58_s28, %s1127_s4  ;;  %p1133_p3 = scmp.lt.s32.totalorder %s1127_s4, %s1127_s4 }
  0x28   :  { %p1134_p4 = por %p1133_p3, %p1132_p2 }
  0x2a   :  { %p1135_p5 = pnand %p1134_p4, %p1128_p1 }
  0x2c   :  { %1138 = shalt.err (!%p1135_p5)
}
  0x2d   :  { %63 = dma.hbm_to_vmem [thread:$0]  %s1492_s3, 2048, %s58_s28, [#allocation6], %s1233_s18, %s1233_s18, %s1234_s19  }
  0x2e   :  { %s1237_s17 = smov [#allocation10]   ;;  %s1238_s21 = smov [#allocation11]  }
  0x2f   :  { %s81_s20 = sshll.u32 %s1237_s17, 4  ;;  %s93_s22 = sshll.u32 %s1238_s21, 4  ;;  %s82_s20 = int_to_ptr.vmem [resolvable:$true] %s81_s20  ;;  %s94_s22 = int_to_ptr.vmem [resolvable:$true] %s93_s22 }
  0x30   :  { %s1147_s1 = scalar_lea.vmem %s82_s20, 2048  ;;  %p1152_p7 = scmp.lt.s32.totalorder %s82_s20, %s82_s20 }
  0x31   :  { %p1148_p6 = scmp.ne.s32.totalorder %s82_s20, %s1147_s1  ;;  %p1153_p8 = scmp.lt.s32.totalorder %s1147_s1, %s1147_s1 }
  0x33   :  { %p1154_p9 = por %p1153_p8, %p1152_p7 }
  0x35   :  { %p1155_p10 = pnand %p1154_p9, %p1148_p6 }
  0x37   :  { %1158 = shalt.err (!%p1155_p10)
}
  0x38   :  { %87 = dma.hbm_to_vmem [thread:$0]  %s1494_s5, 2048, %s82_s20, [#allocation9], %s1233_s18, %s1233_s18, %s1234_s19  }
  0x39   :  { %s1167_s3 = scalar_lea.vmem %s94_s22, 2048  ;;  %p1172_p12 = scmp.lt.s32.totalorder %s94_s22, %s94_s22 }
  0x3a   :  { %p1168_p11 = scmp.ne.s32.totalorder %s94_s22, %s1167_s3  ;;  %p1173_p13 = scmp.lt.s32.totalorder %s1167_s3, %s1167_s3 }
  0x3c   :  { %p1174_p0 = por %p1173_p13, %p1172_p12 }
  0x3e   :  { %p1175_p1 = pnand %p1174_p0, %p1168_p11 }
  0x40   :  { %1178 = shalt.err (!%p1175_p1)
}
  0x41   :  { %99 = dma.hbm_to_vmem [thread:$0]  %s1495_s6, 2048, %s94_s22, [#allocation12], %s1233_s18, %s1233_s18, %s1234_s19  }
  0x42   :  { %1219 = dma.done.wait [#allocation3], 2048  }
  0x43   :  { %1220 = vsyncadd [#allocation3], 4294965248 }
  0x44   :  { %1221 = dma.done.wait [#allocation6], 4096  }
  0x45   :  { %1222 = vsyncadd [#allocation6], 4294963200 }
  0x46   :  { %1223 = dma.done.wait [#allocation9], 4096  }
  0x47   :  { %1224 = vsyncadd [#allocation9], 4294963200 }
  0x48   :  { %1225 = dma.done.wait [#allocation12], 2048  }
  0x49   :  { %1226 = vsyncadd [#allocation12], 4294965248  ;;  %v1239_v0 = vmov 0.0   ;;  %vm1240_vm0 = vmmov 0   ;;  %v146_v1 = vld [vmem:[#allocation2 + $0x78] sm:$0xff]  ;;  %v145_v2 = vld [vmem:[#allocation2 + $0x70] sm:$0xff] }
  0x4a   :  { %837 = vmatprep.subr.mxu0 %v1239_v0  ;;  %869 = vmatprep.mubr.msk.f32.mxu0 %vm1240_vm0, %v1239_v0  ;;  %v144_v3 = vld [vmem:[#allocation2 + $0x68] sm:$0xff]  ;;  %v143_v4 = vld [vmem:[#allocation2 + $0x60] sm:$0xff]  ;;  %v240_v5 = vld [vmem:[#allocation5 + $0x78] sm:$0xff] }
  0x4b   :  { %872 = vmatprep.subr.mxu1 %v1239_v0  ;;  %904 = vmatprep.mubr.msk.f32.mxu1 %vm1240_vm0, %v1239_v0  ;;  %v142_v6 = vld [vmem:[#allocation2 + $0x58] sm:$0xff]  ;;  %v239_v7 = vld [vmem:[#allocation5 + $0x70] sm:$0xff]  ;;  %v238_v8 = vld [vmem:[#allocation5 + $0x68] sm:$0xff] }
  0x4c   :  { %838 = vmatpush3.msra.mxu0 %v146_v1  ;;  %873 = vmatpush3.msra.mxu1 %v240_v5  ;;  %v141_v9 = vld [vmem:[#allocation2 + $0x50] sm:$0xff]  ;;  %v237_v10 = vld [vmem:[#allocation5 + $0x60] sm:$0xff]  ;;  %v140_v11 = vld [vmem:[#allocation2 + $0x48] sm:$0xff] }
  0x4d   :  { %839 = vmatprep.subr.mxu0 %v1239_v0  ;;  %874 = vmatprep.subr.mxu1 %v1239_v0  ;;  %v236_v12 = vld [vmem:[#allocation5 + $0x58] sm:$0xff]  ;;  %v139_v13 = vld [vmem:[#allocation2 + $0x40] sm:$0xff]  ;;  %v235_v14 = vld [vmem:[#allocation5 + $0x50] sm:$0xff] }
  0x4e   :  { %840 = vmatpush3.msra.mxu0 %v145_v2  ;;  %875 = vmatpush3.msra.mxu1 %v239_v7  ;;  %v138_v15 = vld [vmem:[#allocation2 + $0x38] sm:$0xff]  ;;  %v234_v16 = vld [vmem:[#allocation5 + $0x48] sm:$0xff]  ;;  %v137_v17 = vld [vmem:[#allocation2 + $0x30] sm:$0xff] }
  0x4f   :  { %841 = vmatprep.subr.mxu0 %v1239_v0  ;;  %876 = vmatprep.subr.mxu1 %v1239_v0  ;;  %v233_v18 = vld [vmem:[#allocation5 + $0x40] sm:$0xff]  ;;  %v136_v19 = vld [vmem:[#allocation2 + $0x28] sm:$0xff]  ;;  %v232_v20 = vld [vmem:[#allocation5 + $0x38] sm:$0xff] }
  0x50   :  { %842 = vmatpush3.msra.mxu0 %v144_v3  ;;  %877 = vmatpush3.msra.mxu1 %v238_v8  ;;  %v135_v21 = vld [vmem:[#allocation2 + $0x20] sm:$0xff]  ;;  %v231_v22 = vld [vmem:[#allocation5 + $0x30] sm:$0xff]  ;;  %v134_v23 = vld [vmem:[#allocation2 + $0x18] sm:$0xff] }
  0x51   :  { %843 = vmatprep.subr.mxu0 %v1239_v0  ;;  %878 = vmatprep.subr.mxu1 %v1239_v0  ;;  %v230_v24 = vld [vmem:[#allocation5 + $0x28] sm:$0xff]  ;;  %v133_v25 = vld [vmem:[#allocation2 + $0x10] sm:$0xff]  ;;  %v229_v26 = vld [vmem:[#allocation5 + $0x20] sm:$0xff] }
  0x52   :  { %844 = vmatpush3.msra.mxu0 %v143_v4  ;;  %879 = vmatpush3.msra.mxu1 %v237_v10  ;;  %v132_v27 = vld [vmem:[#allocation2 + $0x8] sm:$0xff]  ;;  %v228_v28 = vld [vmem:[#allocation5 + $0x18] sm:$0xff]  ;;  %v131_v29 = vld [vmem:[#allocation2] sm:$0xff] }
  0x53   :  { %845 = vmatprep.subr.mxu0 %v1239_v0  ;;  %880 = vmatprep.subr.mxu1 %v1239_v0  ;;  %v130_v30 = vld [vmem:[%s1489_s0] sm:$0xff]  ;;  %v227_v31 = vld [vmem:[#allocation5 + $0x10] sm:$0xff]  ;;  %v226_v32 = vld [vmem:[#allocation5 + $0x8] sm:$0xff] }
  0x54   :  { %846 = vmatpush3.msra.mxu0 %v142_v6  ;;  %881 = vmatpush3.msra.mxu1 %v236_v12  ;;  %v225_v33 = vld [vmem:[#allocation5] sm:$0xff]  ;;  %v334_v34 = vld [vmem:[#allocation7 + $0x78] sm:$0xff]  ;;  %v333_v35 = vld [vmem:[#allocation7 + $0x70] sm:$0xff] }
  0x55   :  { %847 = vmatprep.subr.mxu0 %v1239_v0  ;;  %882 = vmatprep.subr.mxu1 %v1239_v0  ;;  %v332_v36 = vld [vmem:[#allocation7 + $0x68] sm:$0xff]  ;;  %v331_v37 = vld [vmem:[#allocation7 + $0x60] sm:$0xff]  ;;  %v330_v38 = vld [vmem:[#allocation7 + $0x58] sm:$0xff] }
  0x56   :  { %848 = vmatpush3.msra.mxu0 %v141_v9  ;;  %883 = vmatpush3.msra.mxu1 %v235_v14  ;;  %v329_v39 = vld [vmem:[#allocation7 + $0x50] sm:$0xff]  ;;  %v328_v40 = vld [vmem:[#allocation7 + $0x48] sm:$0xff]  ;;  %v327_v41 = vld [vmem:[#allocation7 + $0x40] sm:$0xff] }
  0x57   :  { %849 = vmatprep.subr.mxu0 %v1239_v0  ;;  %884 = vmatprep.subr.mxu1 %v1239_v0  ;;  %v326_v42 = vld [vmem:[#allocation7 + $0x38] sm:$0xff]  ;;  %v325_v43 = vld [vmem:[#allocation7 + $0x30] sm:$0xff]  ;;  %v324_v44 = vld [vmem:[#allocation7 + $0x28] sm:$0xff] }
  0x58   :  { %850 = vmatpush3.msra.mxu0 %v140_v11  ;;  %885 = vmatpush3.msra.mxu1 %v234_v16  ;;  %v323_v45 = vld [vmem:[#allocation7 + $0x20] sm:$0xff]  ;;  %v322_v46 = vld [vmem:[#allocation7 + $0x18] sm:$0xff]  ;;  %v321_v52 = vld [vmem:[#allocation7 + $0x10] sm:$0xff] }
  0x59   :  { %851 = vmatprep.subr.mxu0 %v1239_v0  ;;  %886 = vmatprep.subr.mxu1 %v1239_v0  ;;  %v729_v47 = vld [vmem:[%s1496_s7] ss:$0 sm:$0xff]  ;;  %v320_v53 = vld [vmem:[#allocation7 + $0x8] sm:$0xff]  ;;  %v429_v55 = vld [vmem:[#allocation8 + $0x78] sm:$0xff] }
  0x5a   :  { %852 = vmatpush3.msra.mxu0 %v139_v13  ;;  %887 = vmatpush3.msra.mxu1 %v233_v18  ;;  %v319_v54 = vld [vmem:[#allocation7] sm:$0xff]  ;;  %v428_v56 = vld [vmem:[#allocation8 + $0x70] sm:$0xff]  ;;  %v427_v57 = vld [vmem:[#allocation8 + $0x68] sm:$0xff] }
  0x5b   :  { %853 = vmatprep.subr.mxu0 %v1239_v0  ;;  %888 = vmatprep.subr.mxu1 %v1239_v0  ;;  %v426_v58 = vld [vmem:[#allocation8 + $0x60] sm:$0xff]  ;;  %v425_v59 = vld [vmem:[#allocation8 + $0x58] sm:$0xff]  ;;  %v424_v60 = vld [vmem:[#allocation8 + $0x50] sm:$0xff] }
  0x5c   :  { %854 = vmatpush3.msra.mxu0 %v138_v15  ;;  %889 = vmatpush3.msra.mxu1 %v232_v20  ;;  %v423_v61 = vld [vmem:[#allocation8 + $0x48] sm:$0xff]  ;;  %v422_v62 = vld [vmem:[#allocation8 + $0x40] sm:$0xff]  ;;  %v421_v63 = vld [vmem:[#allocation8 + $0x38] sm:$0xff] }
  0x5d   :  { %855 = vmatprep.subr.mxu0 %v1239_v0  ;;  %890 = vmatprep.subr.mxu1 %v1239_v0  ;;  %v420_v1 = vld [vmem:[#allocation8 + $0x30] sm:$0xff]  ;;  %v419_v2 = vld [vmem:[#allocation8 + $0x28] sm:$0xff]  ;;  %v418_v3 = vld [vmem:[#allocation8 + $0x20] sm:$0xff] }
  0x5e   :  { %856 = vmatpush3.msra.mxu0 %v137_v17  ;;  %891 = vmatpush3.msra.mxu1 %v231_v22  ;;  %v417_v4 = vld [vmem:[#allocation8 + $0x18] sm:$0xff]  ;;  %v730_v5 = vld [vmem:[%s1497_s8] ss:$0 sm:$0xff]  ;;  %v416_v10 = vld [vmem:[#allocation8 + $0x10] sm:$0xff] }
  0x5f   :  { %857 = vmatprep.subr.mxu0 %v1239_v0  ;;  %892 = vmatprep.subr.mxu1 %v1239_v0  ;;  %v415_v11 = vld [vmem:[#allocation8 + $0x8] sm:$0xff]  ;;  %v414_v12 = vld [vmem:[#allocation8] sm:$0xff]  ;;  %v523_v13 = vld [vmem:[#allocation10 + $0x78] sm:$0xff] }
  0x60   :  { %858 = vmatpush3.msra.mxu0 %v136_v19  ;;  %893 = vmatpush3.msra.mxu1 %v230_v24  ;;  %v522_v14 = vld [vmem:[#allocation10 + $0x70] sm:$0xff]  ;;  %v521_v15 = vld [vmem:[#allocation10 + $0x68] sm:$0xff]  ;;  %v520_v16 = vld [vmem:[#allocation10 + $0x60] sm:$0xff] }
  0x61   :  { %859 = vmatprep.subr.mxu0 %v1239_v0  ;;  %894 = vmatprep.subr.mxu1 %v1239_v0  ;;  %v519_v17 = vld [vmem:[#allocation10 + $0x58] sm:$0xff]  ;;  %v518_v18 = vld [vmem:[#allocation10 + $0x50] sm:$0xff]  ;;  %v517_v19 = vld [vmem:[#allocation10 + $0x48] sm:$0xff] }
  0x62   :  { %860 = vmatpush3.msra.mxu0 %v135_v21  ;;  %895 = vmatpush3.msra.mxu1 %v229_v26  ;;  %v516_v20 = vld [vmem:[#allocation10 + $0x40] sm:$0xff]  ;;  %v515_v21 = vld [vmem:[#allocation10 + $0x38] sm:$0xff]  ;;  %v514_v22 = vld [vmem:[#allocation10 + $0x30] sm:$0xff] }
  0x63   :  { %861 = vmatprep.subr.mxu0 %v1239_v0  ;;  %896 = vmatprep.subr.mxu1 %v1239_v0  ;;  %v512_v24 = vld [vmem:[#allocation10 + $0x20] sm:$0xff] }
  0x64   :  { %862 = vmatpush3.msra.mxu0 %v134_v23  ;;  %897 = vmatpush3.msra.mxu1 %v228_v28  ;;  %v513_v23 = vld [vmem:[#allocation10 + $0x28] sm:$0xff]  ;;  %v731_v26 = vld [vmem:[%s1498_s9] ss:$0 sm:$0xff] }
  0x65   :  { %863 = vmatprep.subr.mxu0 %v1239_v0  ;;  %898 = vmatprep.subr.mxu1 %v1239_v0 }
  0x66   :  { %864 = vmatpush3.msra.mxu0 %v133_v25  ;;  %899 = vmatpush3.msra.mxu1 %v227_v31  ;;  %v511_v25 = vld [vmem:[#allocation10 + $0x18] sm:$0xff]  ;;  %v510_v31 = vld [vmem:[#allocation10 + $0x10] sm:$0xff] }
  0x67   :  { %865 = vmatprep.subr.mxu0 %v1239_v0  ;;  %900 = vmatprep.subr.mxu1 %v1239_v0 }
  0x68   :  { %866 = vmatpush3.msra.mxu0 %v132_v27  ;;  %901 = vmatpush3.msra.mxu1 %v226_v32  ;;  %v509_v32 = vld [vmem:[#allocation10 + $0x8] sm:$0xff] }
  0x69   :  { %867 = vmatprep.subr.mxu0 %v1239_v0  ;;  %902 = vmatprep.subr.mxu1 %v1239_v0 }
  0x6a   :  { %868 = vmatpush3.msra.mxu0 %v131_v29  ;;  %903 = vmatpush3.msra.mxu1 %v225_v33  ;;  %v508_v33 = vld [vmem:[#allocation10] sm:$0xff] }
  0x6b   :  { %870 = vmatmul.mubr.f32.vlgmr.msra.gmra.mxu0 %v130_v30  ;;  %907 = vmatprep.subr.mxu0 %v1239_v0 }
  0x6c   :  { %939 = vmatprep.mubr.msk.f32.mxu0 %vm1240_vm0, %v1239_v0  ;;  %942 = vmatprep.subr.mxu1 %v1239_v0 }
  0x6d   :  { %908 = vmatpush3.msra.mxu0 %v334_v34  ;;  %v617_v34 = vld [vmem:[#allocation11 + $0x78] sm:$0xff] }
  0x6e   :  { %909 = vmatprep.subr.mxu0 %v1239_v0 }
  0x6f   :  { %910 = vmatpush3.msra.mxu0 %v333_v35  ;;  %v616_v35 = vld [vmem:[#allocation11 + $0x70] sm:$0xff] }
  0x70   :  { %911 = vmatprep.subr.mxu0 %v1239_v0 }
  0x71   :  { %912 = vmatpush3.msra.mxu0 %v332_v36  ;;  %v615_v36 = vld [vmem:[#allocation11 + $0x68] sm:$0xff] }
  0x72   :  { %913 = vmatprep.subr.mxu0 %v1239_v0 }
  0x73   :  { %914 = vmatpush3.msra.mxu0 %v331_v37  ;;  %v614_v37 = vld [vmem:[#allocation11 + $0x60] sm:$0xff] }
  0x74   :  { %915 = vmatprep.subr.mxu0 %v1239_v0 }
  0x75   :  { %916 = vmatpush3.msra.mxu0 %v330_v38  ;;  %v613_v38 = vld [vmem:[#allocation11 + $0x58] sm:$0xff] }
  0x76   :  { %917 = vmatprep.subr.mxu0 %v1239_v0 }
  0x77   :  { %918 = vmatpush3.msra.mxu0 %v329_v39  ;;  %v612_v39 = vld [vmem:[#allocation11 + $0x50] sm:$0xff] }
  0x78   :  { %919 = vmatprep.subr.mxu0 %v1239_v0 }
  0x79   :  { %920 = vmatpush3.msra.mxu0 %v328_v40  ;;  %v611_v40 = vld [vmem:[#allocation11 + $0x48] sm:$0xff] }
  0x7a   :  { %921 = vmatprep.subr.mxu0 %v1239_v0 }
  0x7b   :  { %922 = vmatpush3.msra.mxu0 %v327_v41  ;;  %v610_v41 = vld [vmem:[#allocation11 + $0x40] sm:$0xff] }
  0x7c   :  { %923 = vmatprep.subr.mxu0 %v1239_v0 }
  0x7d   :  { %924 = vmatpush3.msra.mxu0 %v326_v42  ;;  %v609_v42 = vld [vmem:[#allocation11 + $0x38] sm:$0xff] }
  0x7e   :  { %925 = vmatprep.subr.mxu0 %v1239_v0 }
  0x7f   :  { %926 = vmatpush3.msra.mxu0 %v325_v43  ;;  %v608_v43 = vld [vmem:[#allocation11 + $0x30] sm:$0xff] }
  0x80   :  { %927 = vmatprep.subr.mxu0 %v1239_v0 }
  0x81   :  { %928 = vmatpush3.msra.mxu0 %v324_v44  ;;  %v607_v44 = vld [vmem:[#allocation11 + $0x28] sm:$0xff] }
  0x82   :  { %929 = vmatprep.subr.mxu0 %v1239_v0 }
  0x83   :  { %930 = vmatpush3.msra.mxu0 %v323_v45  ;;  %v606_v45 = vld [vmem:[#allocation11 + $0x20] sm:$0xff] }
  0x84   :  { %931 = vmatprep.subr.mxu0 %v1239_v0 }
  0x85   :  { %932 = vmatpush3.msra.mxu0 %v322_v46  ;;  %v605_v46 = vld [vmem:[#allocation11 + $0x18] sm:$0xff] }
  0x86   :  { %933 = vmatprep.subr.mxu0 %v1239_v0 }
  0x87   :  { %934 = vmatpush3.msra.mxu0 %v321_v52  ;;  %v604_v52 = vld [vmem:[#allocation11 + $0x10] sm:$0xff] }
  0x88   :  { %935 = vmatprep.subr.mxu0 %v1239_v0 }
  0x89   :  { %936 = vmatpush3.msra.mxu0 %v320_v53  ;;  %v603_v53 = vld [vmem:[#allocation11 + $0x8] sm:$0xff] }
  0x8a   :  { %937 = vmatprep.subr.mxu0 %v1239_v0 }
  0x8b   :  { %938 = vmatpush3.msra.mxu0 %v319_v54  ;;  %v602_v54 = vld [vmem:[#allocation11] sm:$0xff] }
  0x8c   :  { %977 = vmatprep.subr.mxu0 %v1239_v0 }
 0x12b   :  { %v220_v48 = vpop.f32.mrf.mxu0 }
 0x12c   :  { %v221_v49 = vadd.f32 %v729_v47, %v220_v48  ;;  %v732_v47 = vld [vmem:[%s1499_s10] ss:$0 sm:$0xff]  ;;  %s1241_s10 = smov [#allocation14]  }
 0x12d   :  { %v871_v50 = vpop.f32.mrf.mxu0  ;;  %s713_s30 = sshll.u32 %s1241_s10, 4  ;;  %s714_s30 = int_to_ptr.vmem [resolvable:$true] %s713_s30 }
 0x12e   :  { %v224_v51 = vmax.f32 %v221_v49, 0.0  ;;  %s1179_s4 = scalar_lea.vmem %s714_s30, 128  ;;  %p1184_p3 = scmp.lt.s32.totalorder %s714_s30, %s714_s30 }
 0x12f   :  { %p1180_p2 = scmp.ne.s32.totalorder %s714_s30, %s1179_s4  ;;  %p1185_p4 = scmp.lt.s32.totalorder %s1179_s4, %s1179_s4 }
 0x130   :  { %905 = vmatmul.mubr.f32.vlgmr.msra.gmra.mxu1 %v224_v51 }
 0x131   :  { %974 = vmatprep.mubr.msk.f32.mxu1 %vm1240_vm0, %v1239_v0  ;;  %943 = vmatpush3.msra.mxu1 %v429_v55  ;;  %v733_v55 = vld [vmem:[%s1500_s11] ss:$0 sm:$0xff]  ;;  %p1186_p5 = por %p1185_p4, %p1184_p3 }
 0x132   :  { %944 = vmatprep.subr.mxu1 %v1239_v0 }
 0x133   :  { %945 = vmatpush3.msra.mxu1 %v428_v56  ;;  %p1187_p6 = pnand %p1186_p5, %p1180_p2 }
 0x134   :  { %946 = vmatprep.subr.mxu1 %v1239_v0 }
 0x135   :  { %947 = vmatpush3.msra.mxu1 %v427_v57 }
 0x136   :  { %948 = vmatprep.subr.mxu1 %v1239_v0 }
 0x137   :  { %949 = vmatpush3.msra.mxu1 %v426_v58 }
 0x138   :  { %950 = vmatprep.subr.mxu1 %v1239_v0 }
 0x139   :  { %951 = vmatpush3.msra.mxu1 %v425_v59 }
 0x13a   :  { %952 = vmatprep.subr.mxu1 %v1239_v0 }
 0x13b   :  { %953 = vmatpush3.msra.mxu1 %v424_v60 }
 0x13c   :  { %954 = vmatprep.subr.mxu1 %v1239_v0 }
 0x13d   :  { %955 = vmatpush3.msra.mxu1 %v423_v61 }
 0x13e   :  { %956 = vmatprep.subr.mxu1 %v1239_v0 }
 0x13f   :  { %957 = vmatpush3.msra.mxu1 %v422_v62 }
 0x140   :  { %958 = vmatprep.subr.mxu1 %v1239_v0 }
 0x141   :  { %959 = vmatpush3.msra.mxu1 %v421_v63 }
 0x142   :  { %960 = vmatprep.subr.mxu1 %v1239_v0 }
 0x143   :  { %961 = vmatpush3.msra.mxu1 %v420_v1 }
 0x144   :  { %962 = vmatprep.subr.mxu1 %v1239_v0 }
 0x145   :  { %963 = vmatpush3.msra.mxu1 %v419_v2 }
 0x146   :  { %964 = vmatprep.subr.mxu1 %v1239_v0 }
 0x147   :  { %965 = vmatpush3.msra.mxu1 %v418_v3 }
 0x148   :  { %966 = vmatprep.subr.mxu1 %v1239_v0 }
 0x149   :  { %967 = vmatpush3.msra.mxu1 %v417_v4 }
 0x14a   :  { %968 = vmatprep.subr.mxu1 %v1239_v0 }
 0x14b   :  { %969 = vmatpush3.msra.mxu1 %v416_v10 }
 0x14c   :  { %970 = vmatprep.subr.mxu1 %v1239_v0 }
 0x14d   :  { %971 = vmatpush3.msra.mxu1 %v415_v11 }
 0x14e   :  { %972 = vmatprep.subr.mxu1 %v1239_v0 }
 0x14f   :  { %973 = vmatpush3.msra.mxu1 %v414_v12 }
 0x150   :  { %1012 = vmatprep.subr.mxu1 %v1239_v0 }
 0x1f0   :  { %v314_v6 = vpop.f32.mrf.mxu1 }
 0x1f1   :  { %v315_v7 = vadd.f32 %v730_v5, %v314_v6 }
 0x1f2   :  { %v906_v8 = vpop.f32.mrf.mxu1 }
 0x1f3   :  { %v318_v9 = vmax.f32 %v315_v7, 0.0 }
 0x1f5   :  { %940 = vmatmul.mubr.f32.vlgmr.msra.gmra.mxu0 %v318_v9 }
 0x1f6   :  { %1009 = vmatprep.mubr.msk.f32.mxu0 %vm1240_vm0, %v1239_v0  ;;  %978 = vmatpush3.msra.mxu0 %v523_v13 }
 0x1f7   :  { %979 = vmatprep.subr.mxu0 %v1239_v0 }
 0x1f8   :  { %980 = vmatpush3.msra.mxu0 %v522_v14 }
 0x1f9   :  { %981 = vmatprep.subr.mxu0 %v1239_v0 }
 0x1fa   :  { %982 = vmatpush3.msra.mxu0 %v521_v15 }
 0x1fb   :  { %983 = vmatprep.subr.mxu0 %v1239_v0 }
 0x1fc   :  { %984 = vmatpush3.msra.mxu0 %v520_v16 }
 0x1fd   :  { %985 = vmatprep.subr.mxu0 %v1239_v0 }
 0x1fe   :  { %986 = vmatpush3.msra.mxu0 %v519_v17 }
 0x1ff   :  { %987 = vmatprep.subr.mxu0 %v1239_v0 }
 0x200   :  { %988 = vmatpush3.msra.mxu0 %v518_v18 }
 0x201   :  { %989 = vmatprep.subr.mxu0 %v1239_v0 }
 0x202   :  { %990 = vmatpush3.msra.mxu0 %v517_v19 }
 0x203   :  { %991 = vmatprep.subr.mxu0 %v1239_v0 }
 0x204   :  { %992 = vmatpush3.msra.mxu0 %v516_v20 }
 0x205   :  { %993 = vmatprep.subr.mxu0 %v1239_v0 }
 0x206   :  { %994 = vmatpush3.msra.mxu0 %v515_v21 }
 0x207   :  { %995 = vmatprep.subr.mxu0 %v1239_v0 }
 0x208   :  { %996 = vmatpush3.msra.mxu0 %v514_v22 }
 0x209   :  { %997 = vmatprep.subr.mxu0 %v1239_v0 }
 0x20a   :  { %998 = vmatpush3.msra.mxu0 %v513_v23 }
 0x20b   :  { %999 = vmatprep.subr.mxu0 %v1239_v0 }
 0x20c   :  { %1000 = vmatpush3.msra.mxu0 %v512_v24 }
 0x20d   :  { %1001 = vmatprep.subr.mxu0 %v1239_v0 }
 0x20e   :  { %1002 = vmatpush3.msra.mxu0 %v511_v25 }
 0x20f   :  { %1003 = vmatprep.subr.mxu0 %v1239_v0 }
 0x210   :  { %1004 = vmatpush3.msra.mxu0 %v510_v31 }
 0x211   :  { %1005 = vmatprep.subr.mxu0 %v1239_v0 }
 0x212   :  { %1006 = vmatpush3.msra.mxu0 %v509_v32 }
 0x213   :  { %1007 = vmatprep.subr.mxu0 %v1239_v0 }
 0x214   :  { %1008 = vmatpush3.msra.mxu0 %v508_v33 }
 0x2b5   :  { %v408_v27 = vpop.f32.mrf.mxu0 }
 0x2b6   :  { %v409_v28 = vadd.f32 %v731_v26, %v408_v27 }
 0x2b7   :  { %v941_v29 = vpop.f32.mrf.mxu0 }
 0x2b8   :  { %v412_v30 = vmax.f32 %v409_v28, 0.0 }
 0x2ba   :  { %413 = vst [vmem:[#allocation14] sm:$0xff] %v412_v30  ;;  %975 = vmatmul.mubr.f32.vlgmr.msra.gmra.mxu1 %v412_v30 }
 0x2bb   :  { %1044 = vmatprep.mubr.msk.f32.mxu1 %vm1240_vm0, %v1239_v0  ;;  %1013 = vmatpush3.msra.mxu1 %v617_v34 }
 0x2bc   :  { %1014 = vmatprep.subr.mxu1 %v1239_v0 }
 0x2bd   :  { %1015 = vmatpush3.msra.mxu1 %v616_v35 }
 0x2be   :  { %1016 = vmatprep.subr.mxu1 %v1239_v0 }
 0x2bf   :  { %1017 = vmatpush3.msra.mxu1 %v615_v36 }
 0x2c0   :  { %1018 = vmatprep.subr.mxu1 %v1239_v0 }
 0x2c1   :  { %1019 = vmatpush3.msra.mxu1 %v614_v37 }
 0x2c2   :  { %1020 = vmatprep.subr.mxu1 %v1239_v0 }
 0x2c3   :  { %1021 = vmatpush3.msra.mxu1 %v613_v38 }
 0x2c4   :  { %1022 = vmatprep.subr.mxu1 %v1239_v0 }
 0x2c5   :  { %1023 = vmatpush3.msra.mxu1 %v612_v39 }
 0x2c6   :  { %1024 = vmatprep.subr.mxu1 %v1239_v0 }
 0x2c7   :  { %1025 = vmatpush3.msra.mxu1 %v611_v40 }
 0x2c8   :  { %1026 = vmatprep.subr.mxu1 %v1239_v0 }
 0x2c9   :  { %1027 = vmatpush3.msra.mxu1 %v610_v41 }
 0x2ca   :  { %1028 = vmatprep.subr.mxu1 %v1239_v0 }
 0x2cb   :  { %1029 = vmatpush3.msra.mxu1 %v609_v42 }
 0x2cc   :  { %1030 = vmatprep.subr.mxu1 %v1239_v0 }
 0x2cd   :  { %1031 = vmatpush3.msra.mxu1 %v608_v43 }
 0x2ce   :  { %1032 = vmatprep.subr.mxu1 %v1239_v0 }
 0x2cf   :  { %1033 = vmatpush3.msra.mxu1 %v607_v44 }
 0x2d0   :  { %1034 = vmatprep.subr.mxu1 %v1239_v0 }
 0x2d1   :  { %1035 = vmatpush3.msra.mxu1 %v606_v45 }
 0x2d2   :  { %1036 = vmatprep.subr.mxu1 %v1239_v0 }
 0x2d3   :  { %1037 = vmatpush3.msra.mxu1 %v605_v46 }
 0x2d4   :  { %1038 = vmatprep.subr.mxu1 %v1239_v0 }
 0x2d5   :  { %1039 = vmatpush3.msra.mxu1 %v604_v52 }
 0x2d6   :  { %1040 = vmatprep.subr.mxu1 %v1239_v0 }
 0x2d7   :  { %1041 = vmatpush3.msra.mxu1 %v603_v53 }
 0x2d8   :  { %1042 = vmatprep.subr.mxu1 %v1239_v0 }
 0x2d9   :  { %1043 = vmatpush3.msra.mxu1 %v602_v54 }
 0x37a   :  { %v503_v48 = vpop.f32.mrf.mxu1 }
 0x37b   :  { %v504_v49 = vadd.f32 %v732_v47, %v503_v48 }
 0x37c   :  { %v976_v50 = vpop.f32.mrf.mxu1 }
 0x37d   :  { %v507_v51 = vmax.f32 %v504_v49, 0.0 }
 0x37f   :  { %1010 = vmatmul.mubr.f32.vlgmr.msra.gmra.mxu0 %v507_v51 }
 0x43f   :  { %v597_v56 = vpop.f32.mrf.mxu0 }
 0x440   :  { %v598_v57 = vadd.f32 %v733_v55, %v597_v56 }
 0x441   :  { %v1011_v58 = vpop.f32.mrf.mxu0 }
 0x442   :  { %v601_v59 = vmax.f32 %v598_v57, 0.0 }
 0x444   :  { %1045 = vmatmul.mubr.f32.vlgmr.msra.gmra.mxu1 %v601_v59 }
 0x445   :  { %1190 = shalt.err (!%p1187_p6)
}
 0x446   :  { %716 = dma.vmem_to_hbm [thread:$0]  %s714_s30, 128, %s1503_s14, [#allocation15]   ;;  %v734_v0 = vld [vmem:[%s1501_s12] ss:$0 sm:$0xff] }
 0x447   :  { %s1242_s20 = smov [#allocation13]  }
 0x448   :  { %s703_s21 = sshll.u32 %s1242_s20, 4  ;;  %s704_s21 = int_to_ptr.vmem [resolvable:$true] %s703_s21 }
 0x449   :  { %s1199_s22 = scalar_lea.vmem %s704_s21, 128  ;;  %p1204_p8 = scmp.lt.s32.totalorder %s704_s21, %s704_s21 }
 0x44a   :  { %p1200_p7 = scmp.ne.s32.totalorder %s704_s21, %s1199_s22  ;;  %p1205_p9 = scmp.lt.s32.totalorder %s1199_s22, %s1199_s22 }
 0x44c   :  { %p1206_p10 = por %p1205_p9, %p1204_p8 }
 0x44e   :  { %p1207_p11 = pnand %p1206_p10, %p1200_p7 }
 0x504   :  { %v691_v60 = vpop.f32.mrf.mxu1 }
 0x505   :  { %v692_v61 = vadd.f32 %v734_v0, %v691_v60 }
 0x506   :  { %v1046_v62 = vpop.f32.mrf.mxu1 }
 0x507   :  { %v695_v63 = vmax.f32 %v692_v61, 0.0 }
 0x509   :  { %696 = vst [vmem:[#allocation13] sm:$0xff] %v695_v63 }
 0x50a   :  { %1210 = shalt.err (!%p1207_p11)
}
 0x50b   :  { %706 = dma.vmem_to_hbm [thread:$0]  %s704_s21, 128, %s1502_s13, [#allocation4]  }
 0x50c   :  { %1227 = dma.done.wait [#allocation4], 128  }
 0x50d   :  { %1228 = vsyncadd [#allocation4], 4294967168 }
 0x50e   :  { %1229 = dma.done.wait [#allocation15], 128  }
 0x50f   :  { %1230 = vsyncadd [#allocation15], 4294967168 }
 0x510   :  { %723 = vsyncpa [#allocation3], 1 }
 0x511   :  { %724 = vsyncpa [#allocation6], 1 }
 0x512   :  { %725 = vsyncpa [#allocation9], 1 }
 0x513   :  { %726 = vsyncpa [#allocation12], 1 }
 0x514   :  { %727 = vsyncpa [#allocation4], 1 }
 0x515   :  { %728 = vsyncpa [#allocation15], 1 }

</bundles_post_ra>
